<compile_context>
chip_gen: v5e
topology: v5e:2x2
jax: 0.10.0
libtpu: 0.0.40
codegen_flags: <defaults>
</compile_context>

<pallas_src>
import math

import jax
import jax.numpy as jnp
from jax.experimental import pallas as pl
from jax.experimental.pallas import tpu as pltpu

IGNORE_INDEX = -100

# Per-buffer VMEM budget for the logits tile. Double-buffered this is ~32 MiB,
# large enough (>10 MiB DMAs) to hide per-step pipeline overhead, small enough
# for every TPU generation's VMEM.
_DEFAULT_BLOCK_BYTES = 16 * 1024 * 1024


def _ce_kernel(logits_ref, tgt_ref, nll_ref):
    """One row tile: logits (TM, V), targets (TM, 1) -> per-token NLL (TM, 1).

    Every grid step writes disjoint output rows, so the grid axis is fully
    parallel; the cross-row reduction (sum / mean) happens outside the kernel.
    """
    logits = logits_ref[...].astype(jnp.float32)               # (TM, V)
    tgt = tgt_ref[...]                                         # (TM, 1) int32

    # numerically stable log-sum-exp
    m = jnp.max(logits, axis=-1, keepdims=True)                # (TM, 1)
    shifted = logits - m                                       # (TM, V)
    lse = jnp.log(jnp.sum(jnp.exp(shifted), axis=-1, keepdims=True))

    # pick the shifted logit at the target class via one-hot select (no gather)
    col = jax.lax.broadcasted_iota(jnp.int32, logits.shape, 1)  # (TM, V)
    tgt_shifted = jnp.sum(jnp.where(col == tgt, shifted, 0.0),
                          axis=-1, keepdims=True)               # (TM, 1)

    valid = tgt != IGNORE_INDEX                                 # (TM, 1)
    nll_ref[...] = jnp.where(valid, lse - tgt_shifted, 0.0)


def gpt2_cross_entropy_loss(logits, targets, *, block_rows=None,
                            block_bytes=_DEFAULT_BLOCK_BYTES):
    """logits: [..., V] float; targets: [...] int.  Returns scalar f32 loss.

    Matches nn.CrossEntropyLoss() defaults (reduction='mean', ignore_index=-100).
    If every target is ignored the result is NaN, same as PyTorch.
    Out-of-range targets (not -100, not in [0, V)) are not range-checked.
    """
    V = logits.shape[-1]
    N = math.prod(logits.shape[:-1])

    logits2d = logits.reshape(N, V)
    targets1d = targets.reshape(N).astype(jnp.int32)

    itemsize = jnp.dtype(logits.dtype).itemsize
    # sublane alignment: 8 rows for 32-bit dtypes, 16 for 16-bit (bf16 packing)
    align = 16 if itemsize < 4 else 8

    if block_rows is None:
        block_rows = max(align, (block_bytes // (V * itemsize)) // align * align)
    else:
        block_rows = max(align, -(-block_rows // align) * align)
    # never tile wider than the (alignment-padded) number of rows
    block_rows = min(block_rows, -(-N // align) * align)

    n_pad = -(-N // block_rows) * block_rows
    if n_pad != N:
        # padded rows get IGNORE_INDEX targets -> zero loss, zero count
        logits2d = jnp.pad(logits2d, ((0, n_pad - N), (0, 0)))
        targets1d = jnp.pad(targets1d, (0, n_pad - N),
                            constant_values=IGNORE_INDEX)
    targets2d = targets1d.reshape(n_pad, 1)
    num_tiles = n_pad // block_rows

    # Raise the scoped-VMEM limit so the large double-buffered logits tiles are
    # accepted; stays below v7x's 64 MiB physical VMEM with default sizing.
    vmem_limit = int(min(max(48 * 1024 * 1024,
                             2 * block_rows * V * itemsize + (8 << 20)),
                         112 * 1024 * 1024))

    nll = pl.pallas_call(
        _ce_kernel,
        out_shape=jax.ShapeDtypeStruct((n_pad, 1), jnp.float32),
        grid_spec=pltpu.PrefetchScalarGridSpec(
            num_scalar_prefetch=0,
            grid=(num_tiles,),
            in_specs=[
                pl.BlockSpec((block_rows, V), lambda i: (i, 0)),
                pl.BlockSpec((block_rows, 1), lambda i: (i, 0)),
            ],
            out_specs=pl.BlockSpec((block_rows, 1), lambda i: (i, 0)),
        ),
        compiler_params=pltpu.CompilerParams(
            dimension_semantics=("parallel",),
            vmem_limit_bytes=vmem_limit,
        ),
    )(logits2d, targets2d)

    # mean over non-ignored tokens (padded rows are ignored by construction)
    loss_sum = jnp.sum(nll)
    valid_cnt = jnp.sum((targets1d != IGNORE_INDEX).astype(jnp.float32))
    return (loss_sum / valid_cnt).astype(jnp.float32)


def _reference(logits, targets):
    """Pure-JAX nn.CrossEntropyLoss(mean, ignore_index=-100) reference."""
    V = logits.shape[-1]
    logp = jax.nn.log_softmax(logits.reshape(-1, V).astype(jnp.float32), axis=-1)
    t = targets.reshape(-1).astype(jnp.int32)
    valid = t != IGNORE_INDEX
    safe_t = jnp.where(valid, t, 0)
    nll = -jnp.take_along_axis(logp, safe_t[:, None], axis=1)[:, 0]
    return jnp.sum(jnp.where(valid, nll, 0.0)) / jnp.sum(valid).astype(jnp.float32)


if __name__ == "__main__":
    key = jax.random.PRNGKey(0)

    # Case 1: small GPT-2-like shapes, includes an ignored target.
    B, T, V = 2, 8, 32
    k1, k2 = jax.random.split(key)
    logits = jax.random.normal(k1, (B, T, V), dtype=jnp.float32)
    targets = jax.random.randint(k2, (B, T), 0, V, dtype=jnp.int32)
    targets = targets.at[0, 0].set(IGNORE_INDEX)

    loss = jax.block_until_ready(gpt2_cross_entropy_loss(logits, targets))
    ref = _reference(logits, targets)
    assert jnp.allclose(loss, ref, atol=1e-4, rtol=1e-5), (loss, ref)

    # Case 2: N not a multiple of the row tile + multi-step parallel grid
    # (exercises the padding path and per-step independent output writes).
    B2, T2, V2 = 3, 7, 160
    k3, k4 = jax.random.split(k2)
    logits2 = jax.random.normal(k3, (B2, T2, V2), dtype=jnp.float32)
    targets2 = jax.random.randint(k4, (B2, T2), 0, V2, dtype=jnp.int32)

    loss2 = jax.block_until_ready(
        gpt2_cross_entropy_loss(logits2, targets2, block_rows=8))
    ref2 = _reference(logits2, targets2)
    assert jnp.allclose(loss2, ref2, atol=1e-4, rtol=1e-5), (loss2, ref2)

    print("KERNEL_OK")
</pallas_src>

<mosaic_0001>
module attributes {stable_mosaic.version = 11 : i64} {
  func.func @_ce_kernel(%arg0: i32, %arg1: memref<16x32xf32, #tpu.memory_space<vmem>>, %arg2: memref<16x1xi32, #tpu.memory_space<vmem>>, %arg3: memref<16x1xf32, #tpu.memory_space<vmem>>) attributes {dimension_semantics = [#tpu.dimension_semantics<parallel>], iteration_bounds = array<i64: 1>, scalar_prefetch = 0 : i64, scratch_operands = 0 : i64, tpu.core_type = #tpu.core_type<tc>, window_params = [{transform_indices = @transform_0, window_bounds = array<i64: 16, 32>}, {transform_indices = @transform_1, window_bounds = array<i64: 16, 1>}, {transform_indices = @transform_2, window_bounds = array<i64: 16, 1>}]} {
    %c0 = arith.constant 0 : index
    %c0_0 = arith.constant 0 : index
    %0 = vector.load %arg1[%c0, %c0_0] : memref<16x32xf32, #tpu.memory_space<vmem>>, vector<16x32xf32>
    %c0_1 = arith.constant 0 : index
    %c0_2 = arith.constant 0 : index
    %1 = vector.load %arg2[%c0_1, %c0_2] : memref<16x1xi32, #tpu.memory_space<vmem>>, vector<16x1xi32>
    %cst = arith.constant dense<0xFF800000> : vector<16xf32>
    %2 = vector.multi_reduction <maximumf>, %0, %cst [1] : vector<16x32xf32> to vector<16xf32>
    %3 = vector.shape_cast %2 : vector<16xf32> to vector<16x1xf32>
    %4 = vector.broadcast %3 : vector<16x1xf32> to vector<16x32xf32>
    %5 = arith.subf %0, %4 : vector<16x32xf32>
    %6 = math.exp %5 : vector<16x32xf32>
    %cst_3 = arith.constant dense<0.000000e+00> : vector<16xf32>
    %7 = vector.multi_reduction <add>, %6, %cst_3 [1] : vector<16x32xf32> to vector<16xf32>
    %8 = vector.shape_cast %7 : vector<16xf32> to vector<16x1xf32>
    %9 = math.log %8 : vector<16x1xf32>
    %10 = tpu.iota {dimensions = array<i32: 1>} : vector<16x32xi32>
    %11 = vector.broadcast %1 : vector<16x1xi32> to vector<16x32xi32>
    %12 = arith.cmpi eq, %10, %11 : vector<16x32xi32>
    %cst_4 = arith.constant 0.000000e+00 : f32
    %13 = vector.broadcast %cst_4 : f32 to vector<16x32xf32>
    %14 = arith.select %12, %5, %13 : vector<16x32xi1>, vector<16x32xf32>
    %cst_5 = arith.constant dense<0.000000e+00> : vector<16xf32>
    %15 = vector.multi_reduction <add>, %14, %cst_5 [1] : vector<16x32xf32> to vector<16xf32>
    %16 = vector.shape_cast %15 : vector<16xf32> to vector<16x1xf32>
    %c-100_i32 = arith.constant -100 : i32
    %17 = vector.broadcast %c-100_i32 : i32 to vector<16x1xi32>
    %18 = arith.cmpi ne, %1, %17 : vector<16x1xi32>
    %19 = arith.subf %9, %16 : vector<16x1xf32>
    %cst_6 = arith.constant 0.000000e+00 : f32
    %20 = vector.broadcast %cst_6 : f32 to vector<16x1xf32>
    %21 = arith.select %18, %19, %20 : vector<16x1xi1>, vector<16x1xf32>
    %c0_7 = arith.constant 0 : index
    %c0_8 = arith.constant 0 : index
    %22 = vector.load %arg3[%c0_7, %c0_8] : memref<16x1xf32, #tpu.memory_space<vmem>>, vector<16x1xf32>
    tpu.vector_store %arg3[%c0_7, %c0_8], %21 {strides = array<i32>} : memref<16x1xf32, #tpu.memory_space<vmem>>, vector<16x1xf32>,
    return
  }
  func.func @transform_0(%arg0: i32) -> (i32, i32) {
    %c0_i32 = arith.constant 0 : i32
    %c0_i32_0 = arith.constant 0 : i32
    return %arg0, %c0_i32 : i32, i32
  }
  func.func @transform_1(%arg0: i32) -> (i32, i32) {
    %c0_i32 = arith.constant 0 : i32
    %c0_i32_0 = arith.constant 0 : i32
    return %arg0, %c0_i32 : i32, i32
  }
  func.func @transform_2(%arg0: i32) -> (i32, i32) {
    %c0_i32 = arith.constant 0 : i32
    %c0_i32_0 = arith.constant 0 : i32
    return %arg0, %c0_i32 : i32, i32
  }
}

</mosaic_0001>

<bundles_post_ra>
// kernel: tpu_custom_call.1
= control target key start
LH: loop header
LB: loop body
LE: loop exit
PB: predicated region body
PF: predicated region fallthrough
CT: control target
= control target key end

     0   :  { %vm15_vm0 = vcmask 261120   ;;  %v80_v1 = vmov 0   ;;  %v38_v7 = vlaneseq  ;;  %vm62_vm4 = vcmask 7168   ;;  %s120_s0 = inlined_call_operand.vmem [shape: f32[16,32], index: 0, kind: input, shape index: {}]   ;;  %s121_s1 = inlined_call_operand.vmem [shape: s32[16,1], index: 1, kind: input, shape index: {}]   ;;  %s122_s2 = inlined_call_operand.vmem [shape: f32[16,1], index: 2, kind: output, shape index: {}]  }
   0x1   :  { %v11_v0 = vld [vmem:[%s120_s0] sm:$0xff]  ;;  %70 = vset.pattern.permute.xlu1 %v80_v1  ;;  %71 = vset.pattern.permute.xlu0 %v80_v1  ;;  %v12_v4 = vld [vmem:[%s120_s0 + $0x8] sm:$0xff] }
   0x2   :  { %v13_v2 = vld [vmem:[%s121_s1] sm:$0xff]  ;;  %v16_v3 = vsel %vm15_vm0, %v11_v0, -inf  ;;  %v14_v5 = vld [vmem:[%s121_s1 + $0x8] sm:$0xff]  ;;  %v19_v6 = vsel %vm15_vm0, %v12_v4, -inf  ;;  %v39_v8 = vand.u32 127, %v38_v7 }
   0x3   :  { %41 = vperm.xlu1 %70, %v13_v2   ;;  %17 = vmax.xlane.f32.xlu0 %v16_v3  ;;  %vm56_vm3 = vcmp.ne.s32.totalorder %v13_v2, 4294967196  ;;  %vm57_vm5 = vcmp.ne.s32.totalorder %v14_v5, 4294967196 }
   0xb   :  { %44 = vperm.xlu1 %70, %v14_v5   ;;  %20 = vmax.xlane.f32.xlu0 %v19_v6 }
  0x75   :  { %v42_v9 = vpop.permute.xlu1 %41 }
  0x76   :  { %v18_v10 = vpop.xlane.xlu0 %17  ;;  %vm46_vm1 = vcmp.eq.s32.totalorder %v39_v8, %v42_v9 }
  0x77   :  { %v22_v11 = vsub.f32 %v11_v0, %v18_v10 }
  0x79   :  { %v24_v12 = vmul.f32 1.442695, %v22_v11  ;;  %v48_v13 = vsel %vm46_vm1, %v22_v11, 0.0 }
  0x7a   :  { %v50_v14 = vsel %vm15_vm0, %v48_v13, 0.0 }
  0x7b   :  { %72 = vpow2.f32 %v24_v12  ;;  %51 = vadd.xlane.f32.xlu0 %v50_v14 }
  0x7d   :  { %v45_v15 = vpop.permute.xlu1 %44 }
  0x7e   :  { %v21_v16 = vpop.xlane.xlu0 %20  ;;  %vm47_vm2 = vcmp.eq.s32.totalorder %v39_v8, %v45_v15 }
  0x7f   :  { %v23_v17 = vsub.f32 %v12_v4, %v21_v16 }
  0x81   :  { %v73_v18 = vpop.eup %72  ;;  %v26_v19 = vmul.f32 1.442695, %v23_v17  ;;  %v49_v20 = vsel %vm47_vm2, %v23_v17, 0.0 }
  0x82   :  { %v28_v21 = vsel %vm15_vm0, %v73_v18, 0.0  ;;  %v53_v22 = vsel %vm15_vm0, %v49_v20, 0.0 }
  0x83   :  { %74 = vpow2.f32 %v26_v19  ;;  %29 = vadd.xlane.f32.xlu2 %v28_v21  ;;  %54 = vadd.xlane.f32.xlu1 %v53_v22 }
  0x89   :  { %v75_v23 = vpop.eup %74 }
  0x8a   :  { %v31_v24 = vsel %vm15_vm0, %v75_v23, 0.0 }
  0x8b   :  { %32 = vadd.xlane.f32.xlu2 %v31_v24 }
  0xee   :  { %v52_v29 = vpop.xlane.xlu0 %51 }
  0xf6   :  { %v30_v25 = vpop.xlane.xlu2 %29  ;;  %v55_v34 = vpop.xlane.xlu1 %54 }
  0xf7   :  { %76 = vlog2.f32 %v30_v25 }
  0xfd   :  { %v77_v26 = vpop.eup %76 }
  0xfe   :  { %v35_v27 = vmul.f32 0.6931472, %v77_v26  ;;  %v33_v28 = vpop.xlane.xlu2 %32 }
  0xff   :  { %78 = vlog2.f32 %v33_v28 }
 0x100   :  { %v58_v30 = vsub.f32 %v35_v27, %v52_v29 }
 0x102   :  { %v60_v31 = vsel %vm56_vm3, %v58_v30, 0.0 }
 0x103   :  { %63 = vst.msk [vmem:[%s122_s2] sm:$0xff] %vm62_vm4, %v60_v31 }
 0x105   :  { %v79_v32 = vpop.eup %78 }
 0x106   :  { %v37_v33 = vmul.f32 0.6931472, %v79_v32 }
 0x108   :  { %v59_v35 = vsub.f32 %v37_v33, %v55_v34 }
 0x10a   :  { %v61_v36 = vsel %vm57_vm5, %v59_v35, 0.0 }
 0x10b   :  { %64 = vst.msk [vmem:[%s122_s2 + $0x8] sm:$0xff] %vm62_vm4, %v61_v36 }

</bundles_post_ra>
